<compile_context>
chip_gen: v7x
topology: tpu7x:2x2x1
jax: 0.10.0
libtpu: 0.0.40
codegen_flags: <defaults>
</compile_context>

<pallas_src>
import functools

import jax
import jax.numpy as jnp
from jax.experimental import pallas as pl
from jax.experimental.pallas import tpu as pltpu

_SUBLANE = 8  # f32 sublane count


def _round_up(n, m):
    return ((n + m - 1) // m) * m


def _mlp_kernel(x_ref, w1_ref, b1_ref, w2_ref, b2_ref, o_ref):
    """Fused Linear -> ReLU -> Linear; all operands resident in VMEM."""
    # Cast activations to the weight dtype (bf16 on the perf path) so the MXU
    # runs at its native rate; accumulate in f32.  Bias + ReLU stay f32 on
    # the VPU (v5e has no bf16 VALU).
    x = x_ref[...].astype(w1_ref.dtype)
    h = jnp.dot(x, w1_ref[...], preferred_element_type=jnp.float32)
    h = jnp.maximum(h + b1_ref[...], 0.0)
    y = jnp.dot(h.astype(w2_ref.dtype), w2_ref[...],
                preferred_element_type=jnp.float32)
    o_ref[...] = (y + b2_ref[...]).astype(o_ref.dtype)


def _mlp_call_nogrid(x, w1, b1, w2, b2):
    """Single invocation, no grid / no pipeline machinery (small batches)."""
    batch = x.shape[0]
    d_out = w2.shape[1]
    vmem = pl.BlockSpec(memory_space=pltpu.MemorySpace.VMEM)
    return pl.pallas_call(
        _mlp_kernel,
        out_shape=jax.ShapeDtypeStruct((batch, d_out), jnp.float32),
        in_specs=[vmem, vmem, vmem, vmem, vmem],
        out_specs=vmem,
    )(x, w1, b1, w2, b2)


def _mlp_call_grid(x, w1, b1, w2, b2, tile_b):
    """Batch-tiled path: weights resident across the grid, batch is parallel.

    grid = cdiv(batch, tile_b): the partial last block is handled by Pallas
    (garbage rows in the padded region are computed but never written back),
    so no wrapper-side pad/slice HBM passes are needed.
    """
    batch, d_in = x.shape
    d_hid = w1.shape[1]
    d_out = w2.shape[1]
    grid = (pl.cdiv(batch, tile_b),)

    flops = 2 * batch * (d_in * d_hid + d_hid * d_out)
    bytes_accessed = (
        x.size * x.dtype.itemsize                # x read
        + batch * d_out * 4                      # y (f32) write
        + w1.size * w1.dtype.itemsize
        + w2.size * w2.dtype.itemsize
        + b1.size * 4 + b2.size * 4)

    return pl.pallas_call(
        _mlp_kernel,
        out_shape=jax.ShapeDtypeStruct((batch, d_out), jnp.float32),
        grid=grid,
        in_specs=[
            pl.BlockSpec((tile_b, d_in), lambda b: (b, 0)),
            pl.BlockSpec((d_in, d_hid), lambda b: (0, 0)),
            pl.BlockSpec((1, d_hid), lambda b: (0, 0)),
            pl.BlockSpec((d_hid, d_out), lambda b: (0, 0)),
            pl.BlockSpec((1, d_out), lambda b: (0, 0)),
        ],
        out_specs=pl.BlockSpec((tile_b, d_out), lambda b: (b, 0)),
        compiler_params=pltpu.CompilerParams(
            dimension_semantics=("parallel",)),
        cost_estimate=pl.CostEstimate(
            flops=flops, transcendentals=0, bytes_accessed=bytes_accessed),
    )(x, w1, b1, w2, b2)


@functools.partial(jax.jit, static_argnames=("tile_b",))
def _mlp_forward(x, w1, b1, w2, b2, *, tile_b):
    if x.shape[0] <= tile_b:
        return _mlp_call_nogrid(x, w1, b1, w2, b2)
    return _mlp_call_grid(x, w1, b1, w2, b2, tile_b)


class InnerMLP:
    """Synthetic inner model: Linear(32,64) -> ReLU -> Linear(64,32)."""

    def __init__(self, d_in=32, d_hidden=64, d_out=32, key=None,
                 tile_b=2048, param_dtype=jnp.bfloat16):
        if key is None:
            key = jax.random.PRNGKey(0)
        k1, k2, k3, k4 = jax.random.split(key, 4)
        self.d_in, self.d_hidden, self.d_out = d_in, d_hidden, d_out
        # tile_b must be a multiple of the f32 sublane count (8).
        self.tile_b = _round_up(int(tile_b), _SUBLANE)

        # Logical f32 parameters (master copy, used by the plain-JAX ref).
        self.w1 = (jax.random.normal(k1, (d_in, d_hidden), jnp.float32)
                   / jnp.sqrt(d_in))
        self.b1 = 0.1 * jax.random.normal(k2, (1, d_hidden), jnp.float32)
        self.w2 = (jax.random.normal(k3, (d_hidden, d_out), jnp.float32)
                   / jnp.sqrt(d_hidden))
        self.b2 = 0.1 * jax.random.normal(k4, (1, d_out), jnp.float32)

        # Kernel-facing weights in the MXU-native dtype (bf16 by default on
        # all current generations).  Biases stay f32.
        self.w1_k = self.w1.astype(param_dtype)
        self.w2_k = self.w2.astype(param_dtype)

    def __call__(self, x):
        return _mlp_forward(x, self.w1_k, self.b1, self.w2_k, self.b2,
                            tile_b=self.tile_b)


class Model:
    """JAX/Pallas analogue of the PyTorch `Model` wrapper.

    Stores an inner model; forward(x) == self.model(x).
    """

    def __init__(self, model=None, save_path=None):
        self.model = model
        self.save_path = save_path  # path bookkeeping only; no checkpoint I/O

    def forward(self, x):
        return self.model(x)

    __call__ = forward


def _reference_forward(x, inner):
    """Plain-JAX f32 reference of the inner model."""
    h = jnp.maximum(x @ inner.w1 + inner.b1, 0.0)
    return h @ inner.w2 + inner.b2


if __name__ == "__main__":
    key = jax.random.PRNGKey(0)
    k_x, k_params, k_x2 = jax.random.split(key, 3)

    batch, d_in = 8, 32
    x = jax.random.normal(k_x, (batch, d_in), jnp.float32)

    # 1) f32 params: bit-tight check of the fused kernel (no-grid path).
    inner_f32 = InnerMLP(key=k_params, param_dtype=jnp.float32)
    y = jax.block_until_ready(Model(model=inner_f32)(x))
    y_ref = _reference_forward(x, inner_f32)
    assert y.shape == (batch, 32)
    assert jnp.allclose(y, y_ref, atol=1e-5, rtol=1e-5), "mismatch (f32)"

    # 2) bf16-weight perf default, same no-grid path (looser tolerance).
    inner = InnerMLP(key=k_params)  # bf16 weights, tile_b=2048
    y_bf = jax.block_until_ready(Model(model=inner)(x))
    assert y_bf.shape == (batch, 32)
    assert jnp.allclose(y_bf, y_ref, atol=3e-2, rtol=3e-2), "mismatch (bf16)"

    # 3) Grid path with a tiny tile so the test stays small; batch=20 with
    #    tile_b=8 exercises 3 grid steps including a partial last block
    #    (no wrapper-side pad or slice).
    inner_t = InnerMLP(key=k_params, tile_b=8)
    x2 = jax.random.normal(k_x2, (20, d_in), jnp.float32)
    y2 = jax.block_until_ready(Model(model=inner_t)(x2))
    y2_ref = _reference_forward(x2, inner_t)
    assert y2.shape == (20, 32)
    assert jnp.allclose(y2, y2_ref, atol=3e-2, rtol=3e-2), "mismatch (grid)"

    print("KERNEL_OK")
</pallas_src>

<mosaic_0001>
module attributes {stable_mosaic.version = 11 : i64} {
  func.func @_mlp_kernel(%arg0: memref<8x32xf32, #tpu.memory_space<vmem>>, %arg1: memref<32x64xf32, #tpu.memory_space<vmem>>, %arg2: memref<1x64xf32, #tpu.memory_space<vmem>>, %arg3: memref<64x32xf32, #tpu.memory_space<vmem>>, %arg4: memref<1x32xf32, #tpu.memory_space<vmem>>, %arg5: memref<8x32xf32, #tpu.memory_space<vmem>>) attributes {dimension_semantics = [], scalar_prefetch = 0 : i64, scratch_operands = 0 : i64, tpu.core_type = #tpu.core_type<tc>} {
    %c0 = arith.constant 0 : index
    %c0_0 = arith.constant 0 : index
    %0 = vector.load %arg0[%c0, %c0_0] : memref<8x32xf32, #tpu.memory_space<vmem>>, vector<8x32xf32>
    %c0_1 = arith.constant 0 : index
    %c0_2 = arith.constant 0 : index
    %1 = vector.load %arg1[%c0_1, %c0_2] : memref<32x64xf32, #tpu.memory_space<vmem>>, vector<32x64xf32>
    %cst = arith.constant dense<0.000000e+00> : vector<8x64xf32>
    %2 = tpu.matmul %0, %1, %cst {dimension_numbers = #tpu.dot_dimension_numbers<[1], [0], [0], [1], [0, 0, 1, 1], [], []>} : vector<8x32xf32>, vector<32x64xf32>, vector<8x64xf32> -> vector<8x64xf32>
    %c0_3 = arith.constant 0 : index
    %c0_4 = arith.constant 0 : index
    %3 = vector.load %arg2[%c0_3, %c0_4] : memref<1x64xf32, #tpu.memory_space<vmem>>, vector<1x64xf32>
    %4 = vector.broadcast %3 : vector<1x64xf32> to vector<8x64xf32>
    %5 = arith.addf %2, %4 : vector<8x64xf32>
    %cst_5 = arith.constant 0.000000e+00 : f32
    %6 = vector.broadcast %cst_5 : f32 to vector<8x64xf32>
    %7 = arith.maximumf %5, %6 : vector<8x64xf32>
    %c0_6 = arith.constant 0 : index
    %c0_7 = arith.constant 0 : index
    %8 = vector.load %arg3[%c0_6, %c0_7] : memref<64x32xf32, #tpu.memory_space<vmem>>, vector<64x32xf32>
    %cst_8 = arith.constant dense<0.000000e+00> : vector<8x32xf32>
    %9 = tpu.matmul %7, %8, %cst_8 {dimension_numbers = #tpu.dot_dimension_numbers<[1], [0], [0], [1], [0, 0, 1, 1], [], []>} : vector<8x64xf32>, vector<64x32xf32>, vector<8x32xf32> -> vector<8x32xf32>
    %c0_9 = arith.constant 0 : index
    %c0_10 = arith.constant 0 : index
    %10 = vector.load %arg4[%c0_9, %c0_10] : memref<1x32xf32, #tpu.memory_space<vmem>>, vector<1x32xf32>
    %11 = vector.broadcast %10 : vector<1x32xf32> to vector<8x32xf32>
    %12 = arith.addf %9, %11 : vector<8x32xf32>
    %c0_11 = arith.constant 0 : index
    %c0_12 = arith.constant 0 : index
    %13 = vector.load %arg5[%c0_11, %c0_12] : memref<8x32xf32, #tpu.memory_space<vmem>>, vector<8x32xf32>
    tpu.vector_store %arg5[%c0_11, %c0_12], %12 {strides = array<i32>} : memref<8x32xf32, #tpu.memory_space<vmem>>, vector<8x32xf32>,
    return
  }
}

</mosaic_0001>

<bundles_post_ra>
// kernel: _mlp_forward.1
= control target key start
LH: loop header
LB: loop body
LE: loop exit
PB: predicated region body
PF: predicated region fallthrough
CT: control target
= control target key end

     0   :  { %v306_v3 = vmov 0.0|0.0   ;;  %vm307_vm0 = vmmov 0   ;;  %v308_v6 = vmov 0.0   ;;  %s399_s0 = inlined_call_operand.vmem [shape: f32[8,32], index: 0, kind: input, shape index: {}]   ;;  %s400_s1 = inlined_call_operand.vmem [shape: f32[32,64], index: 1, kind: input, shape index: {}]   ;;  %s401_s2 = inlined_call_operand.vmem [shape: f32[1,64], index: 2, kind: input, shape index: {}]   ;;  %s402_s3 = inlined_call_operand.vmem [shape: f32[64,32], index: 3, kind: input, shape index: {}]   ;;  %s403_s4 = inlined_call_operand.vmem [shape: f32[1,32], index: 4, kind: input, shape index: {}]   ;;  %s404_s5 = inlined_call_operand.hbm [shape: f32[8,32], index: 5, kind: output, shape index: {}]  }
   0x1   :  { %v22_v0 = vld [vmem:[%s400_s1] sm:$0xff]  ;;  %v23_v1 = vld [vmem:[%s400_s1 + $0x8] sm:$0xff]  ;;  %v24_v2 = vld [vmem:[%s400_s1 + $0x10] sm:$0xff]  ;;  %260 = vmatprep.subr.bf16.mxu0 %v306_v3  ;;  %238 = vmatprep.mubr.msk.f32.mxu0 %vm307_vm0, %v308_v6 }
   0x2   :  { %v261_v4 = vpack.c.bf16 %v23_v1, %v22_v0  ;;  %v25_v5 = vld [vmem:[%s400_s1 + $0x18] sm:$0xff]  ;;  %v108_v7 = vld [vmem:[%s402_s3] sm:$0xff]  ;;  %266 = vmatprep.subr.bf16.mxu1 %v306_v3  ;;  %v109_v8 = vld [vmem:[%s402_s3 + $0x8] sm:$0xff]  ;;  %257 = vmatprep.mubr.msk.f32.mxu1 %vm307_vm0, %v308_v6 }
   0x3   :  { %v110_v9 = vld [vmem:[%s402_s3 + $0x10] sm:$0xff]  ;;  %v111_v10 = vld [vmem:[%s402_s3 + $0x18] sm:$0xff]  ;;  %v264_v11 = vpack.c.bf16 %v25_v5, %v24_v2  ;;  %v267_v12 = vpack.c.bf16 %v109_v8, %v108_v7 }
   0x4   :  { %262 = vmatpush3.bf16.msra.mxu0 %v261_v4 }
   0x5   :  { %263 = vmatprep.subr.bf16.mxu0 %v306_v3 }
   0x6   :  { %10 = vsyncpa [#allocation3], 0  ;;  %268 = vmatpush3.bf16.msra.mxu1 %v267_v12  ;;  %v270_v13 = vpack.c.bf16 %v111_v10, %v110_v9  ;;  %v112_v14 = vld [vmem:[%s402_s3 + $0x20] sm:$0xff]  ;;  %v113_v15 = vld [vmem:[%s402_s3 + $0x28] sm:$0xff]  ;;  %vm33_vm1 = vcmask 261120   ;;  %vm123_vm2 = vcmask 523264  }
   0x7   :  { %269 = vmatprep.subr.bf16.mxu1 %v306_v3  ;;  %v21_v16 = vld [vmem:[%s399_s0] sm:$0xff]  ;;  %v273_v17 = vpack.c.bf16 %v113_v15, %v112_v14  ;;  %v114_v18 = vld [vmem:[%s402_s3 + $0x30] sm:$0xff]  ;;  %v115_v19 = vld [vmem:[%s402_s3 + $0x38] sm:$0xff]  ;;  %s309_s21 = smov [#allocation2]  }
   0x8   :  { %265 = vmatpush3.bf16.msra.mxu0 %v264_v11  ;;  %v276_v20 = vpack.c.bf16 %v115_v19, %v114_v18  ;;  %v212_v21 = vld [vmem:[%s401_s2] ss:$0 sm:$0xff]  ;;  %s204_s22 = sshll.u32 %s309_s21, 4  ;;  %s205_s22 = int_to_ptr.vmem [resolvable:$true] %s204_s22 }
   0x9   :  { %v214_v26 = vld [vmem:[%s403_s4] ss:$0 sm:$0xff]  ;;  %s282_s3 = scalar_lea.vmem %s205_s22, 128  ;;  %p287_p1 = scmp.lt.s32.totalorder %s205_s22, %s205_s22 }
   0xa   :  { %271 = vmatpush3.bf16.msra.mxu1 %v270_v13  ;;  %p283_p0 = scmp.ne.s32.totalorder %s205_s22, %s282_s3  ;;  %p288_p2 = scmp.lt.s32.totalorder %s282_s3, %s282_s3 }
   0xb   :  { %239 = vmatmul.mubr.msk.f32.vlgmr.msra.gmra.mrb[0].mxu0 %vm33_vm1, %v21_v16  ;;  %272 = vmatprep.subr.bf16.mxu1 %v306_v3 }
   0xc   :  { %p289_p3 = por %p288_p2, %p287_p1 }
   0xe   :  { %274 = vmatpush3.bf16.msra.mxu1 %v273_v17  ;;  %p290_p4 = pnand %p289_p3, %p283_p0 }
   0xf   :  { %275 = vmatprep.subr.bf16.mxu1 %v306_v3 }
  0x12   :  { %277 = vmatpush3.bf16.msra.mxu1 %v276_v20 }
  0xde   :  { %v103_v22 = vpop.f32.mrb[0].mxu0 }
  0xdf   :  { %v104_v23 = vadd.f32 %v212_v21, %v103_v22  ;;  %v240_v24 = vpop.f32.mrb[1].mxu0 }
  0xe1   :  { %v107_v25 = vmax.f32 %v104_v23, 0.0 }
  0xe3   :  { %258 = vmatmul.mubr.msk.f32.vlgmr.msra.gmra.mrb[0].mxu1 %vm123_vm2, %v107_v25 }
 0x1b6   :  { %v193_v27 = vpop.f32.mrb[0].mxu1 }
 0x1b7   :  { %v194_v28 = vadd.f32 %v214_v26, %v193_v27  ;;  %v259_v29 = vpop.f32.mrb[1].mxu1 }
 0x1b9   :  { %197 = vst.msk [vmem:[#allocation2] sm:$0xff] %vm33_vm1, %v194_v28 }
 0x1ba   :  { %293 = shalt.err (!%p290_p4)
}
 0x1bb   :  { %s294_s24 = scalar_lea.hbm %s404_s5, 128 }
 0x1bc   :  { %p295_p5 = scmp.ne.s32.totalorder %s404_s5, %s294_s24  ;;  %p298_p6 = scmp.lt.u32.totalorder %s294_s24, %s404_s5 }
 0x1be   :  { %p300_p7 = pnand %p298_p6, %p295_p5 }
 0x1c0   :  { %303 = shalt.err (!%p300_p7)
}
 0x1c1   :  { %207 = dma.vmem_to_hbm [thread:$0]  %s205_s22, 128, %s404_s5, [#allocation3]  }
 0x1c2   :  { %304 = dma.done.wait [#allocation3], 128  }
 0x1c3   :  { %305 = vsyncadd [#allocation3], 4294967168 }
 0x1c4   :  { %211 = vsyncpa [#allocation3], 1 }

</bundles_post_ra>
